<compile_context>
chip_gen: v7x
topology: tpu7x:2x2x1
jax: 0.10.0
libtpu: 0.0.40
codegen_flags: <defaults>
</compile_context>

<pallas_src>
import numpy as np
import jax
import jax.numpy as jnp
from jax.experimental import pallas as pl
from jax.experimental.pallas import tpu as pltpu

# ---------------- synthetic backbone config ----------------
B, C_IN, H, W = 2, 4, 16, 16      # input (NCHW)
HIDDEN = 32                       # backbone output channels / pos-embed channels
KH = KW = 3
STRIDE = 2
PAD = 1
TEMPERATURE = 10000.0


# ---------------- Pallas kernel: conv stem as im2col GEMM (per-batch, M-tiled) ----------------
def _conv_gemm_kernel(w_ref, p_ref, b_ref, o_ref):
    # w_ref: (HIDDEN, K) bf16   p_ref: (K, TM) bf16   b_ref: (HIDDEN, 1) f32
    # o_ref: (HIDDEN, TM) f32   -- lane dim = TM => dense stores
    acc = jnp.dot(w_ref[...], p_ref[...], preferred_element_type=jnp.float32)
    o_ref[...] = jnp.maximum(acc + b_ref[...], 0.0).astype(o_ref.dtype)   # bias + ReLU in f32


# ---------------- trace-time constant: DETR PositionEmbeddingSine (normalize=False) ----------------
def _sine_pos_embed(hidden, ho, wo):
    npf = hidden // 2
    k = np.arange(npf, dtype=np.float32)
    dim_t = TEMPERATURE ** (2.0 * np.floor(k / 2.0) / np.float32(npf))      # (npf,) per-channel
    inv_dim_t = (1.0 / dim_t)[:, None, None]                                # hoisted, (npf,1,1)
    y = np.arange(1, ho + 1, dtype=np.float32)[None, :, None]
    x = np.arange(1, wo + 1, dtype=np.float32)[None, None, :]
    vy = np.broadcast_to(y * inv_dim_t, (npf, ho, wo))
    vx = np.broadcast_to(x * inv_dim_t, (npf, ho, wo))
    even = (np.arange(npf) % 2 == 0)[:, None, None]
    pos_y = np.where(even, np.sin(vy), np.cos(vy))
    pos_x = np.where(even, np.sin(vx), np.cos(vx))
    pos = np.concatenate([pos_y, pos_x], axis=0).astype(np.float32)         # (hidden, ho, wo)
    return jnp.asarray(pos[None])                                           # (1, hidden, ho, wo)


# ---------------- glue: im2col directly in (B, K=Cin*Kh*Kw, M=Ho*Wo) layout ----------------
def _im2col_bkm(x, kh, kw, stride, pad):
    """x already in the GEMM dtype (bf16) so the 9x blow-up never touches f32."""
    b, c, h, w = x.shape
    xp = jnp.pad(x, ((0, 0), (0, 0), (pad, pad), (pad, pad)))
    ho = (h + 2 * pad - kh) // stride + 1
    wo = (w + 2 * pad - kw) // stride + 1
    cols = []
    for i in range(kh):
        for j in range(kw):
            cols.append(xp[:, :, i:i + stride * ho:stride, j:j + stride * wo:stride])
    # (Kh*Kw, B, C, Ho, Wo) -> (B, C, Kh*Kw, Ho, Wo) -> (B, C*Kh*Kw, Ho*Wo)
    patches = jnp.stack(cols, axis=0).transpose(1, 2, 0, 3, 4)
    return patches.reshape(b, c * kh * kw, ho * wo), ho, wo


def _pick_tm(hw):
    """Largest tile <= 512 that keeps every grid step full-width (prefer tm | hw)."""
    if hw <= 512:
        return hw
    for cand in (512, 384, 256, 128):
        if hw % cand == 0:
            return cand
    return 512


def backbone_base_forward(x, conv_w, conv_b):
    """Equivalent of BackboneBase.forward: returns (features, pos_embed)."""
    b = x.shape[0]
    k_dim = C_IN * KH * KW

    # bf16 cast *before* im2col (half the wrapper-side HBM traffic on the 9x patch tensor)
    x_bf16 = x.astype(jnp.bfloat16)
    patches, ho, wo = _im2col_bkm(x_bf16, KH, KW, STRIDE, PAD)   # (B, K, Ho*Wo) bf16
    hw = ho * wo

    # weight (Cout, Cin, Kh, Kw) flattens directly to GEMM layout (Cout, Cin*Kh*Kw)
    w_mat = conv_w.reshape(HIDDEN, k_dim).astype(jnp.bfloat16)
    b_col = conv_b.reshape(HIDDEN, 1).astype(jnp.float32)

    tm = _pick_tm(hw)
    grid = (b, pl.cdiv(hw, tm))          # >= 2 steps -> both v7x TensorCores get work

    # Per-generation-safe VMEM budget: double-buffered patches + double-buffered output
    # + resident weight/bias, with 4x headroom (well under v5e's 16 MiB default too).
    vmem_bytes = (2 * k_dim * tm * 2) + (2 * HIDDEN * tm * 4) + (HIDDEN * k_dim * 2) + HIDDEN * 4
    vmem_limit = int(min(64 << 20, max(4 << 20, 4 * vmem_bytes)))

    feat = pl.pallas_call(
        _conv_gemm_kernel,
        out_shape=jax.ShapeDtypeStruct((b, HIDDEN, hw), jnp.float32),
        grid=grid,
        in_specs=[
            pl.BlockSpec((HIDDEN, k_dim), lambda bi, mi: (0, 0)),                 # weight, resident
            pl.BlockSpec((pl.Squeezed(), k_dim, tm), lambda bi, mi: (bi, 0, mi)),  # per-batch M-tiled patches
            pl.BlockSpec((HIDDEN, 1), lambda bi, mi: (0, 0)),                     # bias, resident
        ],
        out_specs=pl.BlockSpec((pl.Squeezed(), HIDDEN, tm), lambda bi, mi: (bi, 0, mi)),
        compiler_params=pltpu.CompilerParams(
            dimension_semantics=("parallel", "parallel"),
            vmem_limit_bytes=vmem_limit),
    )(w_mat, patches, b_col)

    # (B, HIDDEN, Ho*Wo) -> (B, HIDDEN, Ho, Wo): only splits the last dim, no transpose copy.
    features = feat.reshape(b, HIDDEN, ho, wo)

    # Batch-invariant positional embedding, built at trace time (constant-folded by XLA).
    pos_embed = _sine_pos_embed(HIDDEN, ho, wo)                 # (1, HIDDEN, Ho, Wo)

    return features, pos_embed


if __name__ == "__main__":
    key = jax.random.PRNGKey(0)
    kx, kw_, kb = jax.random.split(key, 3)
    x = jax.random.normal(kx, (B, C_IN, H, W), dtype=jnp.float32)
    conv_w = 0.05 * jax.random.normal(kw_, (HIDDEN, C_IN, KH, KW), dtype=jnp.float32)
    conv_b = 0.01 * jax.random.normal(kb, (HIDDEN,), dtype=jnp.float32)

    features, pos_embed = jax.jit(backbone_base_forward)(x, conv_w, conv_b)
    jax.block_until_ready((features, pos_embed))

    assert features.shape == (B, HIDDEN, H // STRIDE, W // STRIDE)
    assert pos_embed.shape == (1, HIDDEN, H // STRIDE, W // STRIDE)

    # Tolerance-based correctness check vs a pure-JAX f32 conv reference (bf16 MXU inputs).
    ref = jax.lax.conv_general_dilated(
        x, conv_w, window_strides=(STRIDE, STRIDE),
        padding=((PAD, PAD), (PAD, PAD)),
        dimension_numbers=("NCHW", "OIHW", "NCHW"))
    ref = jnp.maximum(ref + conv_b[None, :, None, None], 0.0)
    max_err = float(jnp.max(jnp.abs(features - ref)))
    assert max_err < 5e-2, f"max abs error vs f32 reference too large: {max_err}"

    print("KERNEL_OK")
</pallas_src>

<mosaic_0001>
module attributes {stable_mosaic.version = 11 : i64} {
  func.func @_conv_gemm_kernel(%arg0: i32, %arg1: i32, %arg2: memref<32x36xbf16, #tpu.memory_space<vmem>>, %arg3: memref<1x36x64xbf16, #tpu.memory_space<vmem>>, %arg4: memref<32x1xf32, #tpu.memory_space<vmem>>, %arg5: memref<1x32x64xf32, #tpu.memory_space<vmem>>) attributes {dimension_semantics = [#tpu.dimension_semantics<parallel>, #tpu.dimension_semantics<parallel>], iteration_bounds = array<i64: 2, 1>, scalar_prefetch = 0 : i64, scratch_operands = 0 : i64, tpu.core_type = #tpu.core_type<tc>, window_params = [{pipeline_mode = #tpu.pipeline_mode<synchronous>, transform_indices = @transform_0, window_bounds = array<i64: 32, 36>}, {transform_indices = @transform_1, window_bounds = array<i64: 1, 36, 64>}, {pipeline_mode = #tpu.pipeline_mode<synchronous>, transform_indices = @transform_2, window_bounds = array<i64: 32, 1>}, {transform_indices = @transform_3, window_bounds = array<i64: 1, 32, 64>}]} {
    %c0 = arith.constant 0 : index
    %c0_0 = arith.constant 0 : index
    %0 = vector.load %arg2[%c0, %c0_0] : memref<32x36xbf16, #tpu.memory_space<vmem>>, vector<32x36xbf16>
    %c0_1 = arith.constant 0 : index
    %c0_2 = arith.constant 0 : index
    %c0_3 = arith.constant 0 : index
    %1 = vector.load %arg3[%c0_1, %c0_2, %c0_3] : memref<1x36x64xbf16, #tpu.memory_space<vmem>>, vector<1x36x64xbf16>
    %2 = vector.shape_cast %1 : vector<1x36x64xbf16> to vector<36x64xbf16>
    %cst = arith.constant dense<0.000000e+00> : vector<32x64xf32>
    %3 = tpu.matmul %0, %2, %cst {dimension_numbers = #tpu.dot_dimension_numbers<[1], [0], [0], [1], [0, 0, 1, 1], [], []>} : vector<32x36xbf16>, vector<36x64xbf16>, vector<32x64xf32> -> vector<32x64xf32>
    %c0_4 = arith.constant 0 : index
    %c0_5 = arith.constant 0 : index
    %4 = vector.load %arg4[%c0_4, %c0_5] : memref<32x1xf32, #tpu.memory_space<vmem>>, vector<32x1xf32>
    %5 = vector.broadcast %4 : vector<32x1xf32> to vector<32x64xf32>
    %6 = arith.addf %3, %5 : vector<32x64xf32>
    %cst_6 = arith.constant 0.000000e+00 : f32
    %7 = vector.broadcast %cst_6 : f32 to vector<32x64xf32>
    %8 = arith.maximumf %6, %7 : vector<32x64xf32>
    %c0_7 = arith.constant 0 : index
    %c0_8 = arith.constant 0 : index
    %c0_9 = arith.constant 0 : index
    %9 = vector.load %arg5[%c0_7, %c0_8, %c0_9] : memref<1x32x64xf32, #tpu.memory_space<vmem>>, vector<1x32x64xf32>
    %10 = vector.shape_cast %9 : vector<1x32x64xf32> to vector<32x64xf32>
    %11 = vector.shape_cast %8 : vector<32x64xf32> to vector<1x32x64xf32>
    tpu.vector_store %arg5[%c0_7, %c0_8, %c0_9], %11 {strides = array<i32>} : memref<1x32x64xf32, #tpu.memory_space<vmem>>, vector<1x32x64xf32>,
    return
  }
  func.func @transform_0(%arg0: i32, %arg1: i32) -> (i32, i32) {
    %c0_i32 = arith.constant 0 : i32
    %c0_i32_0 = arith.constant 0 : i32
    %c0_i32_1 = arith.constant 0 : i32
    return %c0_i32, %c0_i32_0 : i32, i32
  }
  func.func @transform_1(%arg0: i32, %arg1: i32) -> (i32, i32, i32) {
    %c0_i32 = arith.constant 0 : i32
    %c0_i32_0 = arith.constant 0 : i32
    return %arg0, %c0_i32, %arg1 : i32, i32, i32
  }
  func.func @transform_2(%arg0: i32, %arg1: i32) -> (i32, i32) {
    %c0_i32 = arith.constant 0 : i32
    %c0_i32_0 = arith.constant 0 : i32
    %c0_i32_1 = arith.constant 0 : i32
    return %c0_i32, %c0_i32_0 : i32, i32
  }
  func.func @transform_3(%arg0: i32, %arg1: i32) -> (i32, i32, i32) {
    %c0_i32 = arith.constant 0 : i32
    %c0_i32_0 = arith.constant 0 : i32
    return %arg0, %c0_i32, %arg1 : i32, i32, i32
  }
}

</mosaic_0001>

<bundles_post_ra>
// kernel: backbone_base_forward.1
= control target key start
LH: loop header
LB: loop body
LE: loop exit
PB: predicated region body
PF: predicated region fallthrough
CT: control target
= control target key end

     0   :  { %s525_s12 = smov 0   ;;  %s527_s13 = smov 0   ;;  %s582_s0 = inlined_call_operand.vmem [shape: bf16[32,36], index: 0, kind: input, shape index: {}]   ;;  %s583_s1 = inlined_call_operand.vmem [shape: bf16[2,36,64], index: 1, kind: input, shape index: {}]   ;;  %s584_s2 = inlined_call_operand.vmem [shape: f32[32,1], index: 2, kind: input, shape index: {}]   ;;  %s585_s3 = inlined_call_operand.vmem [shape: f32[2,32,64], index: 3, kind: output, shape index: {}]  }
   0x1   :  { %s529_s14 = smov 0  }
   0x2 LB: > { %s25_s15 = sadd.s32 1, %s498_s13  ;;  %p417_p0 = scmp.ge.s32.totalorder %s502_s14, 1  ;;  %s502_s14 = sphi %s529_s14, %s13_s14   ;;  %s498_s13 = sphi %s527_s13, %s587_s13   ;;  %s494_s12 = sphi %s525_s12, %s586_s12  }
   0x3   : > { %p27_p1 = scmp.ge.s32.totalorder %s25_s15, 2  ;;  %p156_p2 = scmp.lt.s32.totalorder %s502_s14, 3 }
   0x5   : > { %s589_s15 = smov (%p27_p1, %s25_s15), 0  ;;  %p157_p3 = pnand %p417_p0, %p156_p2 }
   0x6   : > { %p186_p4 = scmp.lt.s32.totalorder (!%p157_p3), %s494_s12, 1  ;;  %v478_v0 = vld [vmem:[%s582_s0] sm:$0xff] (!%p157_p3)   ;;  %vm261_vm0 = vcmask (!%p157_p3), 293888   ;;  %v214_v1 = vld [vmem:[%s584_s2 + $0x10] sm:$0xff] (!%p157_p3)  ;;  %v504_v3 = vmov (!%p157_p3), 0   ;;  %v215_v4 = vld [vmem:[%s584_s2 + $0x18] sm:$0xff] (!%p157_p3) }
   0x7   : > { %160 = sbr.rel (%p157_p3) target bundleno = 251 (0xfb), region = 32  ;;  %v212_v2 = vld [vmem:[%s584_s2] sm:$0xff] (!%p157_p3)  ;;  %442 = vmatprep.mubr.msk.bf16.mxu0 (!%p157_p3), %vm261_vm0, %v478_v0  ;;  %474 = vset.pattern.permute.xlu1 (!%p157_p3), %v504_v3  ;;  %v213_v5 = vld [vmem:[%s584_s2 + $0x8] sm:$0xff] (!%p157_p3)  ;;  %vm268_vm1 = vcmask (!%p157_p3), 1041408   ;;  %vm325_vm2 = vcmask (!%p157_p3), 523264  }
   0x8   : > { %473 = vset.pattern.permute.xlu0 (!%p157_p3), %v504_v3  ;;  %228 = vperm.xlu1 (!%p157_p3), %474, %v214_v1   ;;  %v479_v10 = vld [vmem:[%s582_s0 + $0x8] sm:$0xff] (!%p157_p3)  }
   0x9   : > { %218 = vperm.xlu0 (!%p157_p3), %473, %v212_v2  }
   0xc   : > { %233 = vperm.xlu1 (!%p157_p3), %474, %v215_v4  }
   0xd   : > { %223 = vperm.xlu0 (!%p157_p3), %473, %v213_v5  }
   0xe   : > { %s591_s12 = smov (!%p186_p4, %s494_s12), 1 }
   0xf   : > { %s447_s22 = smul.u32 20, %s591_s12  ;;  %s430_s5 = sshll.u32 %s591_s12, 5 }
  0x10   : > { %s201_s8 = scalar_lea.vmem %s585_s3, %s430_s5 }
  0x11   : > { %s193_s27 = scalar_lea.vmem %s583_s1, %s447_s22 }
  0x12   : > { %v475_v6 = vld [vmem:[%s193_s27] sm:$0xff]   ;;  %v476_v7 = vld [vmem:[%s193_s27 + $0x8] sm:$0xff]   ;;  %v477_v8 = vld [vmem:[%s193_s27 + $0x10] ss:$0 sps:$4 sm:$0x33]  }
  0x13   : > { %436 = vmatprep.subr.bf16.mxu0 %v475_v6  ;;  %v270_v9 = vsel %vm268_vm1, %v477_v8, 0 }
  0x14   : > { %437 = vmatpush3.bf16.msra.mxu0 %v475_v6 }
  0x15   : > { %438 = vmatprep.subr.bf16.mxu0 %v476_v7 }
  0x18   : > { %439 = vmatpush3.bf16.msra.mxu0 %v476_v7 }
  0x19   : > { %446 = vmatprep.subr.msk.bf16.mxu0 %vm268_vm1, %v477_v8 }
  0x1c   : > { %441 = vmatpush3.bf16.msra.mxu0 %v270_v9 }
  0x1f   : > { %443 = vmatmul.mubr.msk.bf16.vlgmr.msra.gmra.mrb[0].mxu0 %vm261_vm0, %v479_v10 }
  0x87   : > { %v229_v11 = vpop.permute.xlu1 %228 }
  0x88   : > { %v219_v12 = vpop.permute.xlu0 %218 }
  0x8b   : > { %v234_v16 = vpop.permute.xlu1 %233 }
  0x8c   : > { %v224_v19 = vpop.permute.xlu0 %223 }
  0xf2   : > { %v444_v13 = vpop.f32.mrb[0].mxu0 }
  0xf3   : > { %v315_v14 = vadd.f32 %v444_v13, %v229_v11  ;;  %v306_v15 = vpop.f32.mrb[1].mxu0 }
  0xf4   : > { %v307_v17 = vadd.f32 %v306_v15, %v219_v12  ;;  %v445_v18 = vpop.f32.mrb[2].mxu0 }
  0xf5   : > { %v323_v20 = vmax.f32 %v315_v14, 0.0  ;;  %v318_v21 = vadd.f32 %v445_v18, %v234_v16  ;;  %v309_v22 = vpop.f32.mrb[3].mxu0 }
  0xf6   : > { %v321_v23 = vmax.f32 %v307_v17, 0.0  ;;  %v310_v24 = vadd.f32 %v309_v22, %v224_v19 }
  0xf7   : > { %328 = vst.msk [vmem:[%s201_s8 + $0x10] sm:$0xff] %vm325_vm2, %v323_v20  ;;  %v324_v25 = vmax.f32 %v318_v21, 0.0 }
  0xf8   : > { %326 = vst.msk [vmem:[%s201_s8] sm:$0xff] %vm325_vm2, %v321_v23  ;;  %v322_v26 = vmax.f32 %v310_v24, 0.0 }
  0xf9   : > { %329 = vst.msk [vmem:[%s201_s8 + $0x18] sm:$0xff] %vm325_vm2, %v324_v25 }
  0xfa   : > { %327 = vst.msk [vmem:[%s201_s8 + $0x8] sm:$0xff] %vm325_vm2, %v322_v26 }
  0xfb PF: > { %s13_s14 = sadd.s32 1, %s502_s14   ;;  %s586_s12 = smov %s498_s13 }
  0xfc   : > { %p10_p5 = scmp.ge.s32.totalorder %s13_s14, 4   ;;  %s587_s13 = smov %s589_s15 }
  0xfe   :  { %12 = sbr.rel (!%p10_p5) target bundleno = 2 (0x2), region = 62 }

</bundles_post_ra>
